<compile_context>
chip_gen: v5e
topology: v5e:2x2
jax: 0.10.0
libtpu: 0.0.40
codegen_flags: <defaults>
</compile_context>

<pallas_src>
import jax
import jax.numpy as jnp
from jax.experimental import pallas as pl
from jax.experimental.pallas import tpu as pltpu

OFFLOAD_DTYPE = jnp.bfloat16      # AutoWrappedModule.offload_dtype
COMPUTATION_DTYPE = jnp.float32   # AutoWrappedModule.computation_dtype


def _round_up(x, m):
    return ((x + m - 1) // m) * m


def _wrapped_conv1x1_kernel(x_ref, w_ref, b_ref, o_ref):
    """One (batch, HW-tile) block of the 1x1-conv-as-matmul.

    x_ref: (1, Cin, tile)  float32 (computation dtype), tile on the lane axis
    w_ref: (Cout, Cin)     bfloat16 (offload dtype), VMEM-resident
    b_ref: (Cout, 1)       float32 (pre-onloaded in the wrapper)
    o_ref: (1, Cout, tile) float32, lane-dense stores
    """
    # "Onload" happens here: bf16 weight * bf16-cast activation on the MXU as a
    # single bf16 pass, with f32 (computation-dtype) accumulation.
    x = x_ref[0].astype(jnp.bfloat16)                                # (Cin, tile)
    y = jnp.dot(w_ref[...], x, preferred_element_type=jnp.float32)   # (Cout, tile)
    o_ref[0] = (y + b_ref[...]).astype(o_ref.dtype)


def _choose_tile(hw, n, tile_hw):
    """Pick the spatial tile: lane-dense, big enough to hide per-step overhead,
    small enough to keep >= ~4 grid steps and fit scoped VMEM."""
    if hw <= 128:
        # Full extent (legal even when not a multiple of 128); tiny problem.
        return hw
    hw_aligned = _round_up(hw, 128)
    # Keep at least ~4 total grid steps so double-buffering actually overlaps
    # DMA with compute and both v7x TensorCores get work.
    steps_per_batch = max(1, -(-4 // n))
    tile_for_steps = _round_up(-(-hw // steps_per_batch), 128)
    tile = min(_round_up(tile_hw, 128), tile_for_steps, hw_aligned)
    return max(tile, 128)


def auto_wrapped_conv1x1(x_nchw, weight_oihw, bias_o, *, tile_hw=65536):
    """Forward of AutoWrappedModule(Conv2d(Cin, Cout, 1, bias=True), ...).

    x_nchw:      (N, Cin, H, W)    computation dtype (float32)
    weight_oihw: (Cout, Cin, 1, 1) offload dtype (bfloat16)
    bias_o:      (Cout,)           offload dtype (bfloat16)
    returns:     (N, Cout, H, W)   computation dtype (float32)
    """
    n, cin, h, w = x_nchw.shape
    cout = weight_oihw.shape[0]
    hw = h * w

    # NCHW -> (N, Cin, H*W) is a free reshape (no transpose, no HBM round trip).
    x3d = x_nchw.reshape(n, cin, hw)

    w2d = weight_oihw.reshape(cout, cin)                      # bf16, stays offload dtype
    b2d = bias_o.reshape(cout, 1).astype(COMPUTATION_DTYPE)   # tiny onload, done once

    tile = _choose_tile(hw, n, tile_hw)
    grid = (n, pl.cdiv(hw, tile))   # ragged last HW block handled by Pallas masking

    # VMEM budget with sublane padding (channel dims pad up to 8 sublanes):
    #   2 buffers * (round_up(cin,8) + round_up(cout,8)) * tile * 4 bytes
    # = 8 MiB at cin=4, cout=8, tile=65536 -> fits the 16 MiB v5e scoped
    # default and v6e/v7x's 32 MiB.  Raise the limit only if we exceed it.
    vmem_needed = 2 * (_round_up(cin, 8) + _round_up(cout, 8)) * tile * 4 + (1 << 20)
    cp_kwargs = dict(dimension_semantics=("parallel", "parallel"))
    if vmem_needed > (16 << 20):
        cp_kwargs["vmem_limit_bytes"] = vmem_needed

    cost = pl.CostEstimate(
        flops=2 * n * cout * cin * hw,
        transcendentals=0,
        bytes_accessed=(n * (cin + cout) * hw) * 4 + (cout * cin + cout) * 2,
    )

    out3d = pl.pallas_call(
        _wrapped_conv1x1_kernel,
        out_shape=jax.ShapeDtypeStruct((n, cout, hw), COMPUTATION_DTYPE),
        grid_spec=pltpu.PrefetchScalarGridSpec(
            num_scalar_prefetch=0,
            grid=grid,
            in_specs=[
                # x tile: (1, Cin, tile); Cin equals the full array dim and the
                # tile is lane-aligned -> legal, lane-dense loads.
                pl.BlockSpec((1, cin, tile), lambda b, t: (b, 0, t)),
                # Tiny weight/bias: constant index_map keeps them VMEM-resident
                # (no per-step re-fetch).
                pl.BlockSpec((cout, cin), lambda b, t: (0, 0)),
                pl.BlockSpec((cout, 1), lambda b, t: (0, 0)),
            ],
            out_specs=pl.BlockSpec((1, cout, tile), lambda b, t: (b, 0, t)),
        ),
        compiler_params=pltpu.CompilerParams(**cp_kwargs),
        cost_estimate=cost,
    )(x3d, w2d, b2d)

    return out3d.reshape(n, cout, h, w)


# TODO(synk): AutoWrappedModule's offload()/onload() device-migration state
# machine is host-side bookkeeping with no kernel equivalent; only the
# dtype-onload + wrapped-module forward is implemented here.


if __name__ == "__main__":
    key = jax.random.PRNGKey(0)
    kx, kw, kb = jax.random.split(key, 3)

    N, CIN, H, W = 2, 4, 16, 16
    COUT = 8

    # Input in computation dtype.
    x = jax.random.normal(kx, (N, CIN, H, W), dtype=COMPUTATION_DTYPE)
    # Parameters stored in offload dtype (as AutoWrappedModule.__init__ does).
    weight = (0.1 * jax.random.normal(kw, (COUT, CIN, 1, 1))).astype(OFFLOAD_DTYPE)
    bias = (0.1 * jax.random.normal(kb, (COUT,))).astype(OFFLOAD_DTYPE)

    out = auto_wrapped_conv1x1(x, weight, bias)
    out = jax.block_until_ready(out)

    w_f32 = weight.reshape(COUT, CIN).astype(jnp.float32)
    b_f32 = bias.astype(jnp.float32)

    # Tight reference: same mixed precision as the kernel (bf16 operands,
    # f32 accumulation) -> should match to f32 rounding.
    x_bf = x.astype(jnp.bfloat16).astype(jnp.float32)
    ref_matched = jnp.einsum(
        "oc,nchw->nohw", w_f32, x_bf, precision=jax.lax.Precision.HIGHEST
    ) + b_f32[None, :, None, None]

    # Loose reference: strict computation_dtype=f32 semantics of the original
    # module (activation kept in f32); the bf16 activation cast inside the dot
    # bounds the deviation at bf16 epsilon of the products.
    ref_strict = jnp.einsum(
        "oc,nchw->nohw", w_f32, x, precision=jax.lax.Precision.HIGHEST
    ) + b_f32[None, :, None, None]

    assert out.shape == (N, COUT, H, W)
    assert out.dtype == COMPUTATION_DTYPE
    assert jnp.allclose(out, ref_matched, atol=1e-5, rtol=1e-5)
    assert jnp.allclose(out, ref_strict, atol=2e-2, rtol=2e-2)

    print("KERNEL_OK")
</pallas_src>

<mosaic_0001>
module attributes {stable_mosaic.version = 11 : i64} {
  func.func @_wrapped_conv1x1_kernel(%arg0: i32, %arg1: i32, %arg2: memref<1x4x128xf32, #tpu.memory_space<vmem>>, %arg3: memref<8x4xbf16, #tpu.memory_space<vmem>>, %arg4: memref<8x1xf32, #tpu.memory_space<vmem>>, %arg5: memref<1x8x128xf32, #tpu.memory_space<vmem>>) attributes {dimension_semantics = [#tpu.dimension_semantics<parallel>, #tpu.dimension_semantics<parallel>], iteration_bounds = array<i64: 2, 2>, scalar_prefetch = 0 : i64, scratch_operands = 0 : i64, tpu.core_type = #tpu.core_type<tc>, window_params = [{transform_indices = @transform_0, window_bounds = array<i64: 1, 4, 128>}, {pipeline_mode = #tpu.pipeline_mode<synchronous>, transform_indices = @transform_1, window_bounds = array<i64: 8, 4>}, {pipeline_mode = #tpu.pipeline_mode<synchronous>, transform_indices = @transform_2, window_bounds = array<i64: 8, 1>}, {transform_indices = @transform_3, window_bounds = array<i64: 1, 8, 128>}]} {
    %c0 = arith.constant 0 : index
    %c0_0 = arith.constant 0 : index
    %c0_1 = arith.constant 0 : index
    %0 = vector.load %arg2[%c0, %c0_0, %c0_1] : memref<1x4x128xf32, #tpu.memory_space<vmem>>, vector<1x4x128xf32>
    %1 = vector.shape_cast %0 : vector<1x4x128xf32> to vector<4x128xf32>
    %2 = arith.truncf %1 : vector<4x128xf32> to vector<4x128xbf16>
    %c0_2 = arith.constant 0 : index
    %c0_3 = arith.constant 0 : index
    %3 = vector.load %arg3[%c0_2, %c0_3] : memref<8x4xbf16, #tpu.memory_space<vmem>>, vector<8x4xbf16>
    %cst = arith.constant dense<0.000000e+00> : vector<8x128xf32>
    %4 = tpu.matmul %3, %2, %cst {dimension_numbers = #tpu.dot_dimension_numbers<[1], [0], [0], [1], [0, 0, 1, 1], [], []>} : vector<8x4xbf16>, vector<4x128xbf16>, vector<8x128xf32> -> vector<8x128xf32>
    %c0_4 = arith.constant 0 : index
    %c0_5 = arith.constant 0 : index
    %5 = vector.load %arg4[%c0_4, %c0_5] : memref<8x1xf32, #tpu.memory_space<vmem>>, vector<8x1xf32>
    %6 = vector.broadcast %5 : vector<8x1xf32> to vector<8x128xf32>
    %7 = arith.addf %4, %6 : vector<8x128xf32>
    %c0_6 = arith.constant 0 : index
    %c0_7 = arith.constant 0 : index
    %c0_8 = arith.constant 0 : index
    %8 = vector.load %arg5[%c0_6, %c0_7, %c0_8] : memref<1x8x128xf32, #tpu.memory_space<vmem>>, vector<1x8x128xf32>
    %9 = vector.shape_cast %8 : vector<1x8x128xf32> to vector<8x128xf32>
    %10 = vector.shape_cast %7 : vector<8x128xf32> to vector<1x8x128xf32>
    tpu.vector_store %arg5[%c0_6, %c0_7, %c0_8], %10 {strides = array<i32>} : memref<1x8x128xf32, #tpu.memory_space<vmem>>, vector<1x8x128xf32>,
    return
  }
  func.func @transform_0(%arg0: i32, %arg1: i32) -> (i32, i32, i32) {
    %c0_i32 = arith.constant 0 : i32
    %c0_i32_0 = arith.constant 0 : i32
    return %arg0, %c0_i32, %arg1 : i32, i32, i32
  }
  func.func @transform_1(%arg0: i32, %arg1: i32) -> (i32, i32) {
    %c0_i32 = arith.constant 0 : i32
    %c0_i32_0 = arith.constant 0 : i32
    %c0_i32_1 = arith.constant 0 : i32
    return %c0_i32, %c0_i32_0 : i32, i32
  }
  func.func @transform_2(%arg0: i32, %arg1: i32) -> (i32, i32) {
    %c0_i32 = arith.constant 0 : i32
    %c0_i32_0 = arith.constant 0 : i32
    %c0_i32_1 = arith.constant 0 : i32
    return %c0_i32, %c0_i32_0 : i32, i32
  }
  func.func @transform_3(%arg0: i32, %arg1: i32) -> (i32, i32, i32) {
    %c0_i32 = arith.constant 0 : i32
    %c0_i32_0 = arith.constant 0 : i32
    return %arg0, %c0_i32, %arg1 : i32, i32, i32
  }
}

</mosaic_0001>

<bundles_post_ra>
// kernel: tpu_custom_call.1
= control target key start
LH: loop header
LB: loop body
LE: loop exit
PB: predicated region body
PF: predicated region fallthrough
CT: control target
= control target key end

     0   :  { %8 = vsyncpa [#allocation3], 0  ;;  %s737_s0 = inlined_call_operand.hbm [shape: f32[2,4,256], index: 0, kind: input, shape index: {}]   ;;  %s738_s1 = inlined_call_operand.vmem [shape: bf16[8,4], index: 1, kind: input, shape index: {}]   ;;  %s739_s2 = inlined_call_operand.vmem [shape: f32[8,1], index: 2, kind: input, shape index: {}]   ;;  %s740_s3 = inlined_call_operand.hbm [shape: f32[2,8,256], index: 3, kind: output, shape index: {}]  }
   0x1   :  { %10 = vsyncpa [#allocation3 + $0x1], 0 }
   0x2   :  { %11 = vsyncpa [#allocation4], 0 }
   0x3   :  { %13 = vsyncpa [#allocation4 + $0x1], 0  ;;  %s588_s12 = smov 0   ;;  %s590_s13 = smov 0  }
   0x4   :  { %s592_s14 = smov 0   ;;  %s594_s15 = smov 0  }
   0x5   :  { %s596_s16 = smov 0   ;;  %s598_s17 = smov 0  }
   0x6   :  { %s600_s18 = smov 0   ;;  %s602_s19 = smov 0  }
   0x7 LB: > { %s341_s20 = sadd.s32 4294967295, %s565_s19   ;;  %s342_s21 = sadd.s32 4294967294, %s565_s19   ;;  %s565_s19 = sphi %s602_s19, %s19_s19   ;;  %s561_s18 = sphi %s600_s18, %s754_s18   ;;  %s557_s17 = sphi %s598_s17, %s753_s17   ;;  %s553_s16 = sphi %s596_s16, %s752_s16   ;;  %s549_s15 = sphi %s594_s15, %s751_s15   ;;  %s545_s14 = sphi %s592_s14, %s750_s14   ;;  %s541_s13 = sphi %s590_s13, %s749_s13   ;;  %s537_s12 = sphi %s588_s12, %s748_s12  }
   0x8   : > { %s28_s22 = sadd.s32 1, %s557_s17  ;;  %s31_s23 = sadd.s32 1, %s561_s18 }
   0x9   : > { %p29_p0 = scmp.ge.s32.totalorder %s28_s22, 2  ;;  %s40_s24 = sadd.s32 1, %s545_s14 }
   0xa   : > { %p47_p1 = scmp.ne.s32.totalorder %s545_s14, %s541_s13  ;;  %p48_p2 = scmp.eq.s32.totalorder %s565_s19, 0 }
   0xb   : > { %s756_s22 = smov (%p29_p0, %s28_s22), 0  ;;  %s758_s23 = smov (!%p29_p0, %s31_s23), %s561_s18 }
   0xc   : > { %s36_s25 = ssub.s32 %s557_s17, %s756_s22  ;;  %p641_p3 = por %p48_p2, %p47_p1 }
   0xd   : > { %p33_p4 = scmp.ge.s32.totalorder %s758_s23, 2  ;;  %p53_p5 = scmp.ne.s32.totalorder %s541_s13, %s537_s12 }
   0xe   : > { %p54_p6 = scmp.eq.s32.totalorder %s341_s20, 0  ;;  %p121_p7 = scmp.eq.s32.totalorder %s341_s20, 3 }
   0xf   : > { %s760_s23 = smov (%p33_p4, %s758_s23), 0  ;;  %p127_p10 = scmp.eq.s32.totalorder %s342_s21, 3 }
  0x10   : > { %743 = sst [smem:[#allocation8_spill]] %s760_s23  ;;  %p649_p8 = por %p54_p6, %p53_p5 }
  0x11   : > { %p653_p9 = por %p121_p7, %p47_p1  ;;  %s35_s29 = ssub.s32 %s561_s18, %s760_s23 }
  0x12   : > { %s37_s30 = sor.u32 %s36_s25, %s35_s29  ;;  %p659_p12 = por %p127_p10, %p53_p5 }
  0x13   : > { %p38_p11 = scmp.eq.s32.totalorder %s37_s30, 0  ;;  %p369_p13 = scmp.lt.s32.totalorder %s565_s19, 4 }
  0x14   : > { %s153_s5 = sand.u32 1, %s545_s14   ;;  %s346_s8 = sshll.u32 %s561_s18, 1 }
  0x15   : > { %s666_s6 = scalar_select %p38_p11, %s545_s14, %s40_s24  }
  0x16   : > { %s345_s7 = sshll.u32 %s153_s5, 2  ;;  %s161_s9 = sadd.s32 %s557_s17, %s346_s8 }
  0x17   : > { %s157_s10 = scalar_lea.vmem [#allocation2], %s345_s7  ;;  %s347_s20 = sshll.u32 %s161_s9, 2 }
  0x18   : > { %s167_s11 = sshll.u32 %s157_s10, 4  ;;  %s163_s29 = scalar_lea.hbm %s737_s0, %s347_s20  ;;  %s168_s11 = int_to_ptr.vmem [resolvable:$true] %s167_s11 }
  0x19   : > { %p362_p0 = pnand %p369_p13, %p641_p3  ;;  %s165_s30 = sshll.u32 %s163_s29, 4  ;;  %s166_s30 = int_to_ptr.hbm [resolvable:$true] %s165_s30 }
  0x1a   : > { %p348_p1 = scmp.ge.s32.totalorder %s565_s19, 1  ;;  %s154_s23 = scalar_lea.sflag [#allocation3], %s153_s5 }
  0x1b   : > { %364 = dma.hbm_to_vmem [thread:$0]  (!%p362_p0), %s166_s30, 64, %s168_s11, %s154_s23  }
  0x1c   : > { %p172_p2 = scmp.lt.s32.totalorder %s565_s19, 5 }
  0x1e   : > { %p173_p4 = pnand %p348_p1, %p172_p2 }
  0x1f   : > { %s678_s24 = sand.u32 (!%p173_p4), 1, %s541_s13  }
  0x20   : > { %176 = sbr.rel (%p173_p4) target bundleno = 179 (0xb3), region = 32  ;;  %s349_s7 = sshll.u32 (!%p173_p4), %s678_s24, 2 }
  0x21   : > { %s179_s8 = scalar_lea.sflag (!%p173_p4), [#allocation3], %s678_s24  ;;  %s182_s9 = scalar_lea.vmem (!%p173_p4), [#allocation2], %s349_s7 }
  0x25   : > { %528 = dma.done.wait (%p649_p8), %s179_s8, 64  }
  0x26   : > { %530 = vsyncadd (%p649_p8), %s179_s8, 4294967232  ;;  %v567_v0 = vmov 0   ;;  %v207_v1 = vld [vmem:[%s182_s9] sm:$0xf]  ;;  %vm220_vm0 = vcmask 1041408   ;;  %vm216_vm1 = vcmask 31744  }
  0x27   : > { %436 = vset.pattern.permute.xlu0 %v567_v0  ;;  %v210_v2 = vld [vmem:[%s739_s2] sm:$0xff]  ;;  %v208_v3 = vpack.c.bf16 %v207_v1, %v207_v1  ;;  %s353_s27 = sshll.u32 %s553_s16, 1  ;;  %s350_s21 = sshll.u32 %s678_s24, 3 }
  0x28   : > { %213 = vperm.xlu0 %436, %v210_v2   ;;  %v209_v5 = vld [vmem:[%s738_s1] sm:$0xf]  ;;  %s249_s11 = sadd.s32 %s549_s15, %s353_s27  ;;  %s205_s7 = scalar_lea.vmem [#allocation5], %s350_s21 }
  0x29   : > { %v222_v4 = vsel %vm220_vm0, %v208_v3, 0  ;;  %s354_s20 = sshll.u32 %s249_s11, 3  ;;  %s253_s8 = sshll.u32 %s205_s7, 4  ;;  %s254_s8 = int_to_ptr.vmem [resolvable:$true] %s253_s8 }
  0x2a   : > { %231 = vmatpush.bf16.msra.mxu0 %v222_v4  ;;  %s251_s30 = scalar_lea.hbm %s740_s3, %s354_s20  ;;  %s239_s23 = scalar_lea.sflag [#allocation4], %s678_s24 }
  0x2b   : > { %s255_s9 = sshll.u32 %s251_s30, 4  ;;  %s487_s10 = scalar_lea.hbm %s740_s3, 32  ;;  %s256_s9 = int_to_ptr.hbm [resolvable:$true] %s255_s9 }
  0x2c   : > { %s481_s26 = sshra.s32 %s256_s9, 4  ;;  %s482_s26 = int_to_ptr.hbm [resolvable:$true] %s481_s26 }
  0x2d   : > { %351 = vmatmul.msk.bf16.vlgmr.msra.gmra.mxu0 %vm216_vm1, %v209_v5  ;;  %s483_s15 = scalar_lea.hbm %s482_s26, 8  ;;  %p488_p7 = scmp.lt.s32.totalorder %s482_s26, %s740_s3 }
  0x2e   : > { %p484_p3 = scmp.ne.s32.totalorder %s482_s26, %s483_s15  ;;  %p489_p8 = scmp.lt.s32.totalorder %s487_s10, %s483_s15 }
  0x30   : > { %p485_p5 = pnand %p484_p3, %p653_p9  ;;  %p490_p10 = por %p489_p8, %p488_p7 }
  0x32   : > { %p486_p6 = pneg %p485_p5 }
  0x34   : > { %p491_p11 = pnand %p490_p10, %p486_p6 }
  0x9a   : > { %v214_v6 = vpop.permute.xlu0 %213 }
  0xaa   : > { %v233_v7 = vpop.f32.mrf.mxu0 }
  0xab   : > { %v234_v8 = vadd.f32 %v233_v7, %v214_v6 }
  0xad   : > { %237 = vst [vmem:[%s205_s7] sm:$0xff] %v234_v8 }
  0xae   : > { %494 = shalt.err (!%p491_p11)
}
  0xaf   : > { %359 = dma.vmem_to_hbm [thread:$0]  (%p653_p9), %s254_s8, 128, %s256_s9, %s239_s23  }
  0xb2   : > { %v235_v9 = vpop.f32.mrf.mxu0 }
  0xb3 PF: > { %p370_p13 = scmp.ge.s32.totalorder %s565_s19, 2  ;;  %s267_s24 = sand.u32 1, %s537_s12  }
  0xb4   : > { %s268_s20 = scalar_lea.sflag [#allocation4], %s267_s24 }
  0xb5   : > { %p366_p0 = pnand %p370_p13, %p659_p12 }
  0xb7   : > { %p367_p1 = pneg %p366_p0 }
  0xb9   : > { %532 = dma.done.wait (%p367_p1), %s268_s20, 128  }
  0xba   : > { %534 = vsyncadd (%p367_p1), %s268_s20, 4294967168  ;;  %s19_s19 = sadd.s32 1, %s565_s19   ;;  %s747_s28 = sld [smem:[#allocation8_spill]] }
  0xbb   : > { %p16_p2 = scmp.ge.s32.totalorder %s19_s19, 6   ;;  %s748_s12 = smov %s541_s13 }
  0xbc   : > { %s749_s13 = smov %s545_s14  ;;  %s750_s14 = smov %s666_s6 }
  0xbd   : > { %s751_s15 = smov %s557_s17  ;;  %s752_s16 = smov %s561_s18 }
  0xbe   : > { %s753_s17 = smov %s756_s22  ;;  %18 = sbr.rel (!%p16_p2) target bundleno = 7 (0x7), region = 77 }
  0xc0   : > { %s754_s18 = smov %s747_s28 }
  0xc3   :  { %274 = vsyncpa [#allocation3], 1 }
  0xc4   :  { %276 = vsyncpa [#allocation3 + $0x1], 1 }
  0xc5   :  { %277 = vsyncpa [#allocation4], 1 }
  0xc6   :  { %279 = vsyncpa [#allocation4 + $0x1], 1 }

</bundles_post_ra>
